<compile_context>
chip_gen: v6e
topology: v6e:2x2x1
jax: 0.10.0
libtpu: 0.0.40
codegen_flags: <defaults>
</compile_context>

<pallas_src>
import jax
import jax.numpy as jnp
from jax.experimental import pallas as pl
from jax.experimental.pallas import tpu as pltpu


def _round_up(n, m):
    return ((n + m - 1) // m) * m


def _discriminator_kernel(x_ref, a_ref, w1x_ref, w1a_ref, b1_ref, w2_ref,
                          b2_ref, out_ref):
    # fc1 on the concatenated input, expressed as two dots accumulated in f32
    # (fuses torch.cat([x, a], dim=1) into the kernel).
    h = jnp.dot(x_ref[...], w1x_ref[...], preferred_element_type=jnp.float32)
    h = h + jnp.dot(a_ref[...], w1a_ref[...], preferred_element_type=jnp.float32)
    h = jnp.maximum(h + b1_ref[...], 0.0)                  # (tm, H), ReLU

    # fc2: N=1 matmul -> VPU multiply + XLU lane reduction (w2 is a (1, H) row).
    y = jnp.sum(h * w2_ref[...], axis=-1)                  # (tm,)

    # Relayout to a lane-dense row BEFORE the elementwise tail so the bias add
    # and sigmoid run on dense vregs, then store the dense (1, 1, tm) block.
    y_row = y.reshape(1, 1, -1) + b2_ref[0, 0]              # (1, 1, tm)
    out_ref[...] = jax.nn.sigmoid(y_row).astype(out_ref.dtype)


def discriminator_forward(x, a, params, *, block_batch=8192,
                          vmem_limit_bytes=48 * 1024 * 1024):
    """x: (B, state_dim), a: (B, action_dim). Returns sigmoid probs (B, 1).

    block_batch: rows per grid step.  8192 keeps the per-step DMA well above
    the fixed pipeline overhead while staying inside the 48 MiB scoped VMEM
    limit set below (safe on v5e/v6e's 128 MiB and v7x's 64 MiB physical
    VMEM).  On v5e/v6e it can be swept to 16K+ with a larger limit.
    """
    w1, b1, w2, b2 = params["w1"], params["b1"], params["w2"], params["b2"]
    B, Dx = x.shape
    Da = a.shape[1]
    H = w1.shape[1]
    assert w1.shape[0] == Dx + Da

    # Split w1 so the concat never materializes; w2 as a lane row.
    w1x = w1[:Dx]                    # (Dx, H)
    w1a = w1[Dx:]                    # (Da, H)
    w2_row = w2.reshape(1, H)        # (1, H)
    b1_row = b1.reshape(1, H)        # (1, H)
    b2_s = b2.reshape(1, 1)          # (1, 1) scalar, lives in SMEM

    # Tile rows: multiple of 8 (sublane), at most block_batch, and at most
    # ceil(B/2) so the grid has >= 2 steps whenever possible (both v7x TCs
    # get work).  No padding of the inputs: the last block may be partial;
    # its out-of-bounds rows compute garbage that the wrapper slices off.
    half = -(-B // 2)
    tm = _round_up(max(1, min(block_batch, half)), 8)
    grid_m = pl.cdiv(B, tm)

    out = pl.pallas_call(
        _discriminator_kernel,
        out_shape=jax.ShapeDtypeStruct((grid_m, 1, tm), x.dtype),
        grid=(grid_m,),
        in_specs=[
            # Activations: tiled along batch, pipelined HBM->VMEM.
            pl.BlockSpec((tm, Dx), lambda i: (i, 0)),
            pl.BlockSpec((tm, Da), lambda i: (i, 0)),
            # Weights / biases: resident across all grid steps.
            pl.BlockSpec((Dx, H), lambda i: (0, 0)),
            pl.BlockSpec((Da, H), lambda i: (0, 0)),
            pl.BlockSpec((1, H), lambda i: (0, 0)),
            pl.BlockSpec((1, H), lambda i: (0, 0)),
            # Scalar bias in SMEM (no VMEM tile / DMA descriptor per step).
            pl.BlockSpec(memory_space=pltpu.MemorySpace.SMEM),
        ],
        # Lane-dense output: one (1, 1, tm) row per grid step.
        out_specs=pl.BlockSpec((1, 1, tm), lambda i: (i, 0, 0)),
        compiler_params=pltpu.CompilerParams(
            dimension_semantics=("parallel",),
            vmem_limit_bytes=vmem_limit_bytes),
    )(x, a, w1x, w1a, b1_row, w2_row, b2_s)

    # (grid, 1, tm) -> (grid*tm, 1), drop the padded/garbage rows of the
    # final partial block.
    return out.reshape(grid_m * tm, 1)[:B]


def init_params(key, state_dim, hidden_dim, action_dim, dtype=jnp.float32):
    """Deterministic init matching nn.Linear's U(-1/sqrt(fan_in), 1/sqrt(fan_in))."""
    k1, k2, k3, k4 = jax.random.split(key, 4)
    in1 = state_dim + action_dim
    bound1 = 1.0 / jnp.sqrt(in1)
    bound2 = 1.0 / jnp.sqrt(hidden_dim)
    return {
        "w1": jax.random.uniform(k1, (in1, hidden_dim), dtype, -bound1, bound1),
        "b1": jax.random.uniform(k2, (1, hidden_dim), dtype, -bound1, bound1),
        "w2": jax.random.uniform(k3, (hidden_dim, 1), dtype, -bound2, bound2),
        "b2": jax.random.uniform(k4, (1, 1), dtype, -bound2, bound2),
    }


def _reference_forward(x, a, params):
    cat = jnp.concatenate([x, a], axis=1)
    h = jnp.maximum(cat @ params["w1"] + params["b1"], 0.0)
    return jax.nn.sigmoid(h @ params["w2"] + params["b2"])


if __name__ == "__main__":
    state_dim, hidden_dim, action_dim = 16, 32, 8

    key = jax.random.PRNGKey(0)
    kx, ka, kp = jax.random.split(key, 3)
    params = init_params(kp, state_dim, hidden_dim, action_dim)

    # Case 1: batch that is a clean sublane multiple (single grid step).
    batch = 8
    x = jax.random.normal(kx, (batch, state_dim), jnp.float32)
    a = jax.random.normal(ka, (batch, action_dim), jnp.float32)
    out = jax.block_until_ready(discriminator_forward(x, a, params))
    ref = _reference_forward(x, a, params)
    assert out.shape == (batch, 1)
    assert jnp.allclose(out, ref, atol=1e-5, rtol=1e-5)

    # Case 2: batch that exercises the partial final block (12 rows, tm=8,
    # grid=2; second block reads 4 out-of-bounds rows that get sliced off).
    batch2 = 12
    x2 = jax.random.normal(kx, (batch2, state_dim), jnp.float32)
    a2 = jax.random.normal(ka, (batch2, action_dim), jnp.float32)
    out2 = jax.block_until_ready(discriminator_forward(x2, a2, params))
    ref2 = _reference_forward(x2, a2, params)
    assert out2.shape == (batch2, 1)
    assert jnp.allclose(out2, ref2, atol=1e-5, rtol=1e-5)

    # Case 3: moderate batch, 2 tiles with a partial second tile.
    batch3 = 130
    x3 = jax.random.normal(kx, (batch3, state_dim), jnp.float32)
    a3 = jax.random.normal(ka, (batch3, action_dim), jnp.float32)
    out3 = jax.block_until_ready(discriminator_forward(x3, a3, params))
    ref3 = _reference_forward(x3, a3, params)
    assert out3.shape == (batch3, 1)
    assert jnp.allclose(out3, ref3, atol=1e-5, rtol=1e-5)

    print("KERNEL_OK")
</pallas_src>

<mosaic_0001>
module attributes {stable_mosaic.version = 11 : i64} {
  func.func @_discriminator_kernel(%arg0: i32, %arg1: memref<8x16xf32, #tpu.memory_space<vmem>>, %arg2: memref<8x8xf32, #tpu.memory_space<vmem>>, %arg3: memref<16x32xf32, #tpu.memory_space<vmem>>, %arg4: memref<8x32xf32, #tpu.memory_space<vmem>>, %arg5: memref<1x32xf32, #tpu.memory_space<vmem>>, %arg6: memref<1x32xf32, #tpu.memory_space<vmem>>, %arg7: memref<1x1xf32, #tpu.memory_space<smem>>, %arg8: memref<1x1x8xf32, #tpu.memory_space<vmem>>) attributes {dimension_semantics = [#tpu.dimension_semantics<parallel>], iteration_bounds = array<i64: 1>, scalar_prefetch = 0 : i64, scratch_operands = 0 : i64, tpu.core_type = #tpu.core_type<tc>, window_params = [{transform_indices = @transform_0, window_bounds = array<i64: 8, 16>}, {transform_indices = @transform_1, window_bounds = array<i64: 8, 8>}, {pipeline_mode = #tpu.pipeline_mode<synchronous>, transform_indices = @transform_2, window_bounds = array<i64: 16, 32>}, {pipeline_mode = #tpu.pipeline_mode<synchronous>, transform_indices = @transform_3, window_bounds = array<i64: 8, 32>}, {pipeline_mode = #tpu.pipeline_mode<synchronous>, transform_indices = @transform_4, window_bounds = array<i64: 1, 32>}, {pipeline_mode = #tpu.pipeline_mode<synchronous>, transform_indices = @transform_5, window_bounds = array<i64: 1, 32>}, {transform_indices = @transform_6, window_bounds = array<i64: 1, 1>}, {transform_indices = @transform_7, window_bounds = array<i64: 1, 1, 8>}]} {
    %c0 = arith.constant 0 : index
    %c0_0 = arith.constant 0 : index
    %0 = vector.load %arg1[%c0, %c0_0] : memref<8x16xf32, #tpu.memory_space<vmem>>, vector<8x16xf32>
    %c0_1 = arith.constant 0 : index
    %c0_2 = arith.constant 0 : index
    %1 = vector.load %arg3[%c0_1, %c0_2] : memref<16x32xf32, #tpu.memory_space<vmem>>, vector<16x32xf32>
    %cst = arith.constant dense<0.000000e+00> : vector<8x32xf32>
    %2 = tpu.matmul %0, %1, %cst {dimension_numbers = #tpu.dot_dimension_numbers<[1], [0], [0], [1], [0, 0, 1, 1], [], []>} : vector<8x16xf32>, vector<16x32xf32>, vector<8x32xf32> -> vector<8x32xf32>
    %c0_3 = arith.constant 0 : index
    %c0_4 = arith.constant 0 : index
    %3 = vector.load %arg2[%c0_3, %c0_4] : memref<8x8xf32, #tpu.memory_space<vmem>>, vector<8x8xf32>
    %c0_5 = arith.constant 0 : index
    %c0_6 = arith.constant 0 : index
    %4 = vector.load %arg4[%c0_5, %c0_6] : memref<8x32xf32, #tpu.memory_space<vmem>>, vector<8x32xf32>
    %cst_7 = arith.constant dense<0.000000e+00> : vector<8x32xf32>
    %5 = tpu.matmul %3, %4, %cst_7 {dimension_numbers = #tpu.dot_dimension_numbers<[1], [0], [0], [1], [0, 0, 1, 1], [], []>} : vector<8x8xf32>, vector<8x32xf32>, vector<8x32xf32> -> vector<8x32xf32>
    %6 = arith.addf %2, %5 : vector<8x32xf32>
    %c0_8 = arith.constant 0 : index
    %c0_9 = arith.constant 0 : index
    %7 = vector.load %arg5[%c0_8, %c0_9] : memref<1x32xf32, #tpu.memory_space<vmem>>, vector<1x32xf32>
    %8 = vector.broadcast %7 : vector<1x32xf32> to vector<8x32xf32>
    %9 = arith.addf %6, %8 : vector<8x32xf32>
    %cst_10 = arith.constant 0.000000e+00 : f32
    %10 = vector.broadcast %cst_10 : f32 to vector<8x32xf32>
    %11 = arith.maximumf %9, %10 : vector<8x32xf32>
    %c0_11 = arith.constant 0 : index
    %c0_12 = arith.constant 0 : index
    %12 = vector.load %arg6[%c0_11, %c0_12] : memref<1x32xf32, #tpu.memory_space<vmem>>, vector<1x32xf32>
    %13 = vector.broadcast %12 : vector<1x32xf32> to vector<8x32xf32>
    %14 = arith.mulf %11, %13 : vector<8x32xf32>
    %cst_13 = arith.constant dense<0.000000e+00> : vector<8xf32>
    %15 = vector.multi_reduction <add>, %14, %cst_13 [1] : vector<8x32xf32> to vector<8xf32>
    %16 = vector.shape_cast %15 : vector<8xf32> to vector<1x1x8xf32>
    %c0_14 = arith.constant 0 : index
    %c0_15 = arith.constant 0 : index
    %17 = memref.load %arg7[%c0_14, %c0_15] : memref<1x1xf32, #tpu.memory_space<smem>>
    %18 = vector.broadcast %17 : f32 to vector<1x1x8xf32>
    %19 = arith.addf %16, %18 : vector<1x1x8xf32>
    %20 = arith.negf %19 : vector<1x1x8xf32>
    %21 = math.exp %20 : vector<1x1x8xf32>
    %cst_16 = arith.constant 1.000000e+00 : f32
    %22 = vector.broadcast %cst_16 : f32 to vector<1x1x8xf32>
    %23 = arith.addf %22, %21 : vector<1x1x8xf32>
    %24 = arith.divf %22, %23 : vector<1x1x8xf32>
    %c0_17 = arith.constant 0 : index
    %c0_18 = arith.constant 0 : index
    %c0_19 = arith.constant 0 : index
    %25 = vector.load %arg8[%c0_17, %c0_18, %c0_19] : memref<1x1x8xf32, #tpu.memory_space<vmem>>, vector<1x1x8xf32>
    tpu.vector_store %arg8[%c0_17, %c0_18, %c0_19], %24 {strides = array<i32>} : memref<1x1x8xf32, #tpu.memory_space<vmem>>, vector<1x1x8xf32>,
    return
  }
  func.func @transform_0(%arg0: i32) -> (i32, i32) {
    %c0_i32 = arith.constant 0 : i32
    %c0_i32_0 = arith.constant 0 : i32
    return %arg0, %c0_i32 : i32, i32
  }
  func.func @transform_1(%arg0: i32) -> (i32, i32) {
    %c0_i32 = arith.constant 0 : i32
    %c0_i32_0 = arith.constant 0 : i32
    return %arg0, %c0_i32 : i32, i32
  }
  func.func @transform_2(%arg0: i32) -> (i32, i32) {
    %c0_i32 = arith.constant 0 : i32
    %c0_i32_0 = arith.constant 0 : i32
    %c0_i32_1 = arith.constant 0 : i32
    return %c0_i32, %c0_i32_0 : i32, i32
  }
  func.func @transform_3(%arg0: i32) -> (i32, i32) {
    %c0_i32 = arith.constant 0 : i32
    %c0_i32_0 = arith.constant 0 : i32
    %c0_i32_1 = arith.constant 0 : i32
    return %c0_i32, %c0_i32_0 : i32, i32
  }
  func.func @transform_4(%arg0: i32) -> (i32, i32) {
    %c0_i32 = arith.constant 0 : i32
    %c0_i32_0 = arith.constant 0 : i32
    %c0_i32_1 = arith.constant 0 : i32
    return %c0_i32, %c0_i32_0 : i32, i32
  }
  func.func @transform_5(%arg0: i32) -> (i32, i32) {
    %c0_i32 = arith.constant 0 : i32
    %c0_i32_0 = arith.constant 0 : i32
    %c0_i32_1 = arith.constant 0 : i32
    return %c0_i32, %c0_i32_0 : i32, i32
  }
  func.func @transform_6(%arg0: i32) -> (i32, i32) {
    %c0_i32 = arith.constant 0 : i32
    %c0_i32_0 = arith.constant 0 : i32
    %c0_i32_1 = arith.constant 0 : i32
    return %c0_i32, %c0_i32_0 : i32, i32
  }
  func.func @transform_7(%arg0: i32) -> (i32, i32, i32) {
    %c0_i32 = arith.constant 0 : i32
    %c0_i32_0 = arith.constant 0 : i32
    %c0_i32_1 = arith.constant 0 : i32
    return %arg0, %c0_i32, %c0_i32_0 : i32, i32, i32
  }
}

</mosaic_0001>

<bundles_post_ra>
// kernel: tpu_custom_call.1
= control target key start
LH: loop header
LB: loop body
LE: loop exit
PB: predicated region body
PF: predicated region fallthrough
CT: control target
= control target key end

     0   :  { %13 = vsyncpa [#allocation4], 0  ;;  %s503_s0 = inlined_call_operand.hbm [shape: f32[8,16], index: 0, kind: input, shape index: {}]   ;;  %s504_s1 = inlined_call_operand.hbm [shape: f32[8,8], index: 1, kind: input, shape index: {}]   ;;  %s505_s2 = inlined_call_operand.hbm [shape: f32[16,32], index: 2, kind: input, shape index: {}]   ;;  %s506_s3 = inlined_call_operand.hbm [shape: f32[8,32], index: 3, kind: input, shape index: {}]   ;;  %s507_s4 = inlined_call_operand.vmem [shape: f32[1,32], index: 4, kind: input, shape index: {}]   ;;  %s508_s5 = inlined_call_operand.vmem [shape: f32[1,32], index: 5, kind: input, shape index: {}]   ;;  %s509_s6 = inlined_call_operand.<no memory space> [shape: f32[1,1], index: 6, kind: input, shape index: {}]   ;;  %s510_s7 = inlined_call_operand.hbm [shape: f32[1,1,8], index: 7, kind: output, shape index: {}]  }
   0x1   :  { %14 = vsyncpa [#allocation7], 0 }
   0x2   :  { %15 = vsyncpa [#allocation10], 0 }
   0x3   :  { %16 = vsyncpa [#allocation5], 0  ;;  %s430_s24 = smov [#allocation6]   ;;  %s431_s26 = smov [#allocation3]  }
   0x4   :  { %s33_s25 = sshll.u32 %s430_s24, 4  ;;  %s23_s27 = sshll.u32 %s431_s26, 4  ;;  %s34_s25 = int_to_ptr.vmem [resolvable:$true] %s33_s25  ;;  %s24_s27 = int_to_ptr.vmem [resolvable:$true] %s23_s27 }
   0x5   :  { %s330_s28 = scalar_lea.vmem %s34_s25, 128  ;;  %p335_p1 = scmp.lt.s32.totalorder %s34_s25, %s34_s25 }
   0x6   :  { %p331_p0 = scmp.ne.s32.totalorder %s34_s25, %s330_s28  ;;  %p336_p2 = scmp.lt.s32.totalorder %s330_s28, %s330_s28 }
   0x8   :  { %p337_p3 = por %p336_p2, %p335_p1 }
   0xa   :  { %p338_p4 = pnand %p337_p3, %p331_p0 }
   0xc   :  { %341 = shalt.err (!%p338_p4)
}
   0xd   :  { %36 = dma.hbm_to_vmem [thread:$0]  %s504_s1, 128, %s34_s25, [#allocation7]  }
   0xe   :  { %s350_s8 = scalar_lea.vmem %s24_s27, 128  ;;  %p355_p6 = scmp.lt.s32.totalorder %s24_s27, %s24_s27 }
   0xf   :  { %p351_p5 = scmp.ne.s32.totalorder %s24_s27, %s350_s8  ;;  %p356_p7 = scmp.lt.s32.totalorder %s350_s8, %s350_s8 }
  0x11   :  { %p357_p8 = por %p356_p7, %p355_p6 }
  0x13   :  { %p358_p9 = pnand %p357_p8, %p351_p5 }
  0x15   :  { %361 = shalt.err (!%p358_p9)
}
  0x16   :  { %26 = dma.hbm_to_vmem [thread:$0]  %s503_s0, 128, %s24_s27, [#allocation4]  }
  0x17   :  { %s432_s11 = smov [#allocation8]  }
  0x18   :  { %s42_s12 = sshll.u32 %s432_s11, 4  ;;  %s43_s12 = int_to_ptr.vmem [resolvable:$true] %s42_s12 }
  0x19   :  { %s370_s13 = scalar_lea.vmem %s43_s12, 256  ;;  %p375_p11 = scmp.lt.s32.totalorder %s43_s12, %s43_s12 }
  0x1a   :  { %p371_p10 = scmp.ne.s32.totalorder %s43_s12, %s370_s13  ;;  %p376_p12 = scmp.lt.s32.totalorder %s370_s13, %s370_s13 }
  0x1c   :  { %p377_p13 = por %p376_p12, %p375_p11 }
  0x1e   :  { %p378_p0 = pnand %p377_p13, %p371_p10 }
  0x20   :  { %381 = shalt.err (!%p378_p0)
}
  0x21   :  { %s433_s1 = smov 128   ;;  %s434_s14 = smov 8  }
  0x22   :  { %48 = dma.hbm_to_vmem [thread:$0]  %s505_s2, 256, %s43_s12, [#allocation7], %s433_s1, %s433_s1, %s434_s14  }
  0x23   :  { %s435_s17 = smov [#allocation9]  }
  0x24   :  { %s55_s18 = sshll.u32 %s435_s17, 4  ;;  %s56_s18 = int_to_ptr.vmem [resolvable:$true] %s55_s18 }
  0x25   :  { %s390_s0 = scalar_lea.vmem %s56_s18, 128  ;;  %p395_p2 = scmp.lt.s32.totalorder %s56_s18, %s56_s18 }
  0x26   :  { %p391_p1 = scmp.ne.s32.totalorder %s56_s18, %s390_s0  ;;  %p396_p3 = scmp.lt.s32.totalorder %s390_s0, %s390_s0 }
  0x28   :  { %p397_p4 = por %p396_p3, %p395_p2 }
  0x2a   :  { %p398_p5 = pnand %p397_p4, %p391_p1 }
  0x2c   :  { %401 = shalt.err (!%p398_p5)
}
  0x2d   :  { %58 = dma.hbm_to_vmem [thread:$0]  %s506_s3, 128, %s56_s18, [#allocation10]  }
  0x2e   :  { %422 = dma.done.wait [#allocation4], 128  }
  0x2f   :  { %423 = vsyncadd [#allocation4], 4294967168 }
  0x30   :  { %424 = dma.done.wait [#allocation7], 384  }
  0x31   :  { %425 = vsyncadd [#allocation7], 4294966912 }
  0x32   :  { %426 = dma.done.wait [#allocation10], 128  }
  0x33   :  { %427 = vsyncadd [#allocation10], 4294967168  ;;  %v436_v0 = vmov 0.0   ;;  %vm437_vm0 = vmmov 0   ;;  %vm82_vm1 = vcmask 64512   ;;  %v81_v1 = vld [vmem:[#allocation9] sm:$0xff]  ;;  %v252_v17 = vstv %s509_s6 }
  0x34   :  { %297 = vmatprep.subr.mxu0 %v436_v0  ;;  %302 = vmatprep.subr.mxu1 %v436_v0  ;;  %v79_v2 = vld [vmem:[#allocation8 + $0x8] sm:$0xff]  ;;  %v80_v3 = vld [vmem:[#allocation6] sm:$0xff]  ;;  %v78_v4 = vld [vmem:[#allocation8] sm:$0xff]  ;;  %vm156_vm2 = vcmask 130048   ;;  %vm247_vm3 = vcmask 261120   ;;  %v261_v23 = vlaneseq  ;;  %vm268_vm4 = vcmask 57344  }
  0x35   :  { %299 = vmatprep.mubr.msk.f32.mxu0 %vm437_vm0, %v436_v0  ;;  %306 = vmatprep.mubr.msk.f32.mxu1 %vm437_vm0, %v436_v0  ;;  %v77_v5 = vld [vmem:[#allocation3] sm:$0xff] }
  0x36   :  { %298 = vmatpush3.msra.mxu0 %v81_v1  ;;  %303 = vmatpush3.msra.mxu1 %v79_v2  ;;  %v289_v9 = vld [vmem:[%s507_s4] ss:$0 sm:$0xff]  ;;  %v262_v24 = vand.u32 127, %v261_v23  ;;  %v264_v25 = vshrl.u32 %v261_v23, 7  ;;  %s438_s4 = smov [#allocation11]  }
  0x37   :  { %300 = vmatmul.mubr.msk.f32.vlgmr.msra.gmra.mxu0 %vm82_vm1, %v80_v3  ;;  %304 = vmatprep.subr.mxu1 %v436_v0  ;;  %v290_v13 = vld [vmem:[%s508_s5] ss:$0 sm:$0xff]  ;;  %s276_s5 = sshll.u32 %s438_s4, 4  ;;  %s277_s5 = int_to_ptr.vmem [resolvable:$true] %s276_s5 }
  0x38   :  { %305 = vmatpush3.msra.mxu1 %v78_v4  ;;  %v265_v26 = vsub.s32 %v262_v24, %v264_v25  ;;  %s402_s25 = scalar_lea.vmem %s277_s5, 16  ;;  %s406_s6 = scalar_lea.vmem %s277_s5, 32 }
  0x39   :  { %307 = vmatmul.mubr.msk.f32.vlgmr.msra.gmra.mxu1 %vm156_vm2, %v77_v5  ;;  %p403_p6 = scmp.ne.s32.totalorder %s277_s5, %s402_s25  ;;  %p407_p7 = scmp.lt.s32.totalorder %s277_s5, %s277_s5 }
  0x3a   :  { %p408_p8 = scmp.lt.s32.totalorder %s406_s6, %s402_s25 }
  0x3c   :  { %p409_p9 = por %p408_p8, %p407_p7 }
  0x3e   :  { %p410_p10 = pnand %p409_p9, %p403_p6 }
  0xf7   :  { %v152_v6 = vpop.f32.mrf.mxu0 }
  0xf9   :  { %v301_v7 = vpop.f32.mrf.mxu0  ;;  %v226_v8 = vpop.f32.mrf.mxu1 }
  0xfa   :  { %v227_v10 = vadd.f32 %v226_v8, %v152_v6 }
  0xfb   :  { %v308_v11 = vpop.f32.mrf.mxu1 }
  0xfc   :  { %v237_v12 = vadd.f32 %v289_v9, %v227_v10 }
  0xfe   :  { %v238_v14 = vmax.f32 %v237_v12, 0.0 }
 0x100   :  { %v246_v15 = vmul.f32 %v290_v13, %v238_v14 }
 0x102   :  { %v248_v16 = vsel %vm247_vm3, %v246_v15, 0.0 }
 0x103   :  { %249 = vadd.xlane.f32.xlu0 %v248_v16 }
 0x18c   :  { %v250_v18 = vpop.xlane.xlu0 %249 }
 0x18d   :  { %v253_v19 = vadd.f32 %v252_v17, %v250_v18 }
 0x18f   :  { %v291_v20 = vmul.f32 -1.442695, %v253_v19 }
 0x191   :  { %318 = vpow2.f32 %v291_v20 }
 0x19e   :  { %v319_v21 = vpop.eup %318 }
 0x19f   :  { %v257_v22 = vadd.f32 1.0, %v319_v21 }
 0x1a1   :  { %320 = vrcp.f32 %v257_v22 }
 0x1ae   :  { %v321_v27 = vpop.eup %320 }
 0x1af   :  { %v266_v28 = vrot.slane %v321_v27, %v265_v26 }
 0x1b1   :  { %269 = vst.msk [vmem:[#allocation11] sm:$0x1] %vm268_vm4, %v266_v28 }
 0x1b2   :  { %413 = shalt.err (!%p410_p10)
}
 0x1b3   :  { %279 = dma.vmem_to_hbm [thread:$0]  %s277_s5, 16, %s510_s7, [#allocation5]  }
 0x1b4   :  { %428 = dma.done.wait [#allocation5], 16  }
 0x1b5   :  { %429 = vsyncadd [#allocation5], 4294967280 }
 0x1b6   :  { %283 = vsyncpa [#allocation4], 1 }
 0x1b7   :  { %284 = vsyncpa [#allocation7], 1 }
 0x1b8   :  { %285 = vsyncpa [#allocation10], 1 }
 0x1b9   :  { %286 = vsyncpa [#allocation5], 1 }

</bundles_post_ra>
